<compile_context>
chip_gen: v5e
topology: v5e:2x2
jax: 0.10.0
libtpu: 0.0.40
codegen_flags: <defaults>
</compile_context>

<pallas_src>
import jax
import jax.numpy as jnp
from jax.experimental import pallas as pl
from jax.experimental.pallas import tpu as pltpu


# ----------------------------------------------------------------------------
# Kernel factory: BN+ReLU -> factored 2x2 avg-pool -> 1x1 conv, on one row tile.
# ----------------------------------------------------------------------------
def _make_kernel(W, TRh):
    Wh = W // 2
    W2 = 2 * W

    def kernel(x_ref, s_ref, b_ref, w_ref, pc_ref, o_ref, cp_ref):
        # x_ref : (1, Cin, TRh*2W)  input rows, spatial flattened on lanes
        # s_ref : (Cin, 1) f32      folded BN scale
        # b_ref : (Cin, 1) f32      folded BN bias
        # w_ref : (Cout, Cin) bf16  1x1 conv weight
        # pc_ref: (W, Wh) bf16      column-pool matrix (0.25 entries)
        # o_ref : (1, Cout, TRh*Wh) pooled output, spatial flattened on lanes
        # cp_ref: (Cin, TRh*Wh) f32 VMEM scratch (pooled activations)
        x = x_ref[0].astype(jnp.float32)                            # (Cin, TRh*2W)
        h = jnp.maximum(x * s_ref[...] + b_ref[...], 0.0)           # BN + ReLU (VPU)
        pc = pc_ref[...]                                            # (W, Wh) bf16
        # Factored 2x2 avg-pool, one pooled row per (static, unrolled) step:
        #   row pool   = add the two original rows living in one 2W lane chunk
        #   column pool= small (W, Wh) matmul with 0.25 entries
        for i in range(TRh):
            base = i * W2
            rp = h[:, base:base + W] + h[:, base + W:base + W2]     # (Cin, W)
            cp_ref[:, i * Wh:(i + 1) * Wh] = jnp.dot(
                rp.astype(jnp.bfloat16), pc,
                preferred_element_type=jnp.float32)                 # (Cin, Wh)
        # 1x1 conv on the (4x smaller) pooled activations.
        y = jnp.dot(w_ref[...], cp_ref[...].astype(jnp.bfloat16),
                    preferred_element_type=jnp.float32)             # (Cout, TRh*Wh)
        o_ref[...] = y[None].astype(o_ref.dtype)

    return kernel


# ----------------------------------------------------------------------------
# Helpers
# ----------------------------------------------------------------------------
def _vmem_capacity_bytes():
    """Physical VMEM per core; conservative (v7x = 64 MiB) fallback."""
    try:
        info = pltpu.get_tpu_info()
        cap = getattr(info, "vmem_capacity_bytes", None)
        if cap:
            return int(cap)
    except Exception:
        pass
    return 64 << 20


def _vmem_estimate(trh, W, Cin, Cout, in_bytes):
    """Estimate VMEM use: double-buffered blocks + scratch + in-kernel temporaries."""
    Wh = W // 2
    L = trh * 2 * W           # input lanes per step
    Lo = trh * Wh             # output lanes per step
    f32, bf16 = 4, 2
    blocks = 2 * (Cin * L * in_bytes            # x block (double-buffered)
                  + Cout * Lo * in_bytes        # out block
                  + 2 * Cin * f32               # scale, bias
                  + Cout * Cin * bf16           # conv weight
                  + W * Wh * bf16)              # column-pool matrix
    scratch = Cin * Lo * f32                    # pooled-activation scratch
    temps = (Cin * L * f32                      # h (BN+ReLU result)
             + Cin * L * in_bytes               # upcast copy of x
             + Cin * W * (f32 + bf16)           # per-row pooled pair + bf16 cast
             + Cin * Lo * bf16                  # bf16 cast of scratch for the conv
             + Cout * Lo * f32)                 # conv accumulator
    return int((blocks + scratch + temps) * 1.25)   # 25% headroom


def _pick_row_tile(N, Hh, W, Cin, Cout, in_bytes, budget_bytes):
    """Largest pooled-row tile TRh (divisor of Hh) whose VMEM estimate fits the
    budget.  Blocks must keep the (8,128) rule: full-extent last dims or
    128-aligned lane counts.  Keep >=2 grid steps when a legal smaller tile
    exists (v7x megacore)."""
    Wh = W // 2

    def legal(trh):
        return trh == Hh or ((trh * 2 * W) % 128 == 0 and (trh * Wh) % 128 == 0)

    divs = sorted((d for d in range(1, Hh + 1) if Hh % d == 0), reverse=True)
    legal_divs = [d for d in divs if legal(d)]           # always contains Hh
    fitting = [d for d in legal_divs
               if _vmem_estimate(d, W, Cin, Cout, in_bytes) <= budget_bytes]
    trh = fitting[0] if fitting else legal_divs[-1]
    if N * (Hh // trh) < 2:                               # keep both v7x cores busy
        for d in legal_divs:
            if (d < trh and N * (Hh // d) >= 2
                    and _vmem_estimate(d, W, Cin, Cout, in_bytes) <= budget_bytes):
                trh = d
                break
    return trh


def _colpool_matrix(W):
    """(W, W/2) column-pool matrix: out[j] = 0.25*(in[2j] + in[2j+1])."""
    Wh = W // 2
    c = jnp.arange(W)
    return ((c[:, None] // 2) == jnp.arange(Wh)[None, :]).astype(jnp.float32) * 0.25


# ----------------------------------------------------------------------------
# Module wrapper
# ----------------------------------------------------------------------------
def transition_dws_forward(x_nchw, params, eps=1e-5):
    """x_nchw: (N, Cin, H, W) float32/bfloat16 -> (N, Cout, H//2, W//2) (same dtype)."""
    N, Cin, H, W = x_nchw.shape
    # TODO(synk): odd H/W would need PyTorch's floor behaviour (drop last row/col).
    assert H % 2 == 0 and W % 2 == 0, "avg_pool2d(2) path requires even H, W"

    w = params["conv_w"]
    if w.ndim == 4:                       # accept PyTorch OIHW 1x1 weights
        assert w.shape[2:] == (1, 1)
        w = w.reshape(w.shape[0], w.shape[1])
    Cout = w.shape[0]
    assert w.shape[1] == Cin

    scale = (params["bn_gamma"] / jnp.sqrt(params["bn_var"] + eps)).astype(jnp.float32)
    bias = (params["bn_beta"].astype(jnp.float32)
            - params["bn_mean"].astype(jnp.float32) * scale)

    Hh, Wh = H // 2, W // 2
    in_bytes = jnp.dtype(x_nchw.dtype).itemsize

    cap = _vmem_capacity_bytes()
    budget = int(min(cap, 128 << 20) * 0.45)              # generation-aware budget
    TRh = _pick_row_tile(N, Hh, W, Cin, Cout, in_bytes, budget)
    est = _vmem_estimate(TRh, W, Cin, Cout, in_bytes)
    vmem_limit = int(min(cap - (4 << 20), max(2 * est, 32 << 20)))  # never > physical

    L = TRh * 2 * W           # input lanes per grid step (= TR original rows * W)
    Lo = TRh * Wh             # output lanes per grid step

    x_flat = x_nchw.reshape(N, Cin, H * W)                # free reshape (contiguous)
    w_bf16 = w.astype(jnp.bfloat16)                       # MXU-native operand
    pc_bf16 = _colpool_matrix(W).astype(jnp.bfloat16)     # 0.25 exact in bf16

    # NOTE: if profiling shows exposed input DMA at small Cin, the x BlockSpec can
    # be deepened with pipeline_mode=pl.Buffered(3) (watch VMEM on v7x).
    out_flat = pl.pallas_call(
        _make_kernel(W, TRh),
        out_shape=jax.ShapeDtypeStruct((N, Cout, Hh * Wh), x_nchw.dtype),
        grid_spec=pltpu.PrefetchScalarGridSpec(
            num_scalar_prefetch=0,
            grid=(N, Hh // TRh),
            in_specs=[
                pl.BlockSpec((1, Cin, L), lambda n, t: (n, 0, t)),
                pl.BlockSpec((Cin, 1), lambda n, t: (0, 0)),
                pl.BlockSpec((Cin, 1), lambda n, t: (0, 0)),
                pl.BlockSpec((Cout, Cin), lambda n, t: (0, 0)),
                pl.BlockSpec((W, Wh), lambda n, t: (0, 0)),
            ],
            out_specs=pl.BlockSpec((1, Cout, Lo), lambda n, t: (n, 0, t)),
            scratch_shapes=[pltpu.VMEM((Cin, Lo), jnp.float32)],
        ),
        compiler_params=pltpu.CompilerParams(
            dimension_semantics=("parallel", "parallel"),
            vmem_limit_bytes=vmem_limit),
    )(x_flat, scale.reshape(Cin, 1), bias.reshape(Cin, 1), w_bf16, pc_bf16)

    return out_flat.reshape(N, Cout, Hh, Wh)


# ----------------------------------------------------------------------------
# Pure-JAX reference (mirrors the PyTorch forward) for a sanity check.
# ----------------------------------------------------------------------------
def reference_forward(x_nchw, params, eps=1e-5):
    scale = params["bn_gamma"] / jnp.sqrt(params["bn_var"] + eps)
    bias = params["bn_beta"] - params["bn_mean"] * scale
    h = jnp.maximum(x_nchw * scale[None, :, None, None]
                    + bias[None, :, None, None], 0.0)
    w = params["conv_w"].reshape(params["conv_w"].shape[0], -1)
    y = jnp.einsum("oc,nchw->nohw", w, h)
    N, Co, H, W = y.shape
    return y.reshape(N, Co, H // 2, 2, W // 2, 2).mean(axis=(3, 5))


if __name__ == "__main__":
    # Small config consistent with a DenseNet transition (compression ~0.5).
    in_planes, out_planes = 8, 4
    N, H, W = 2, 16, 16

    key = jax.random.PRNGKey(0)
    ks = jax.random.split(key, 6)

    params = {
        "bn_gamma": jax.random.uniform(ks[0], (in_planes,), jnp.float32, 0.5, 1.5),
        "bn_beta":  jax.random.normal(ks[1], (in_planes,), jnp.float32) * 0.1,
        "bn_mean":  jax.random.normal(ks[2], (in_planes,), jnp.float32) * 0.1,
        "bn_var":   jax.random.uniform(ks[3], (in_planes,), jnp.float32, 0.5, 1.5),
        # 1x1 conv weight in PyTorch OIHW layout, no bias.
        "conv_w":   jax.random.normal(ks[4], (out_planes, in_planes, 1, 1),
                                      jnp.float32) * (1.0 / jnp.sqrt(in_planes)),
    }

    x = jax.random.normal(ks[5], (N, in_planes, H, W), jnp.float32)

    out = jax.block_until_ready(jax.jit(transition_dws_forward)(x, params))
    assert out.shape == (N, out_planes, H // 2, W // 2), out.shape

    ref = jax.block_until_ready(reference_forward(x, params))
    max_err = float(jnp.max(jnp.abs(out - ref)))
    # bf16 MXU operands (f32 accumulation) => loosened tolerance vs pure-f32 math.
    if max_err > 5e-2:
        raise AssertionError(f"mismatch vs reference, max_err={max_err}")

    print("KERNEL_OK")
</pallas_src>

<mosaic_0001>
module attributes {stable_mosaic.version = 11 : i64} {
  func.func @kernel(%arg0: i32, %arg1: i32, %arg2: memref<1x8x256xf32, #tpu.memory_space<vmem>>, %arg3: memref<8x1xf32, #tpu.memory_space<vmem>>, %arg4: memref<8x1xf32, #tpu.memory_space<vmem>>, %arg5: memref<4x8xbf16, #tpu.memory_space<vmem>>, %arg6: memref<16x8xbf16, #tpu.memory_space<vmem>>, %arg7: memref<1x4x64xf32, #tpu.memory_space<vmem>>, %arg8: memref<8x64xf32, #tpu.memory_space<vmem>>) attributes {dimension_semantics = [#tpu.dimension_semantics<parallel>, #tpu.dimension_semantics<parallel>], iteration_bounds = array<i64: 2, 1>, scalar_prefetch = 0 : i64, scratch_operands = 1 : i64, tpu.core_type = #tpu.core_type<tc>, window_params = [{transform_indices = @transform_0, window_bounds = array<i64: 1, 8, 256>}, {pipeline_mode = #tpu.pipeline_mode<synchronous>, transform_indices = @transform_1, window_bounds = array<i64: 8, 1>}, {pipeline_mode = #tpu.pipeline_mode<synchronous>, transform_indices = @transform_2, window_bounds = array<i64: 8, 1>}, {pipeline_mode = #tpu.pipeline_mode<synchronous>, transform_indices = @transform_3, window_bounds = array<i64: 4, 8>}, {pipeline_mode = #tpu.pipeline_mode<synchronous>, transform_indices = @transform_4, window_bounds = array<i64: 16, 8>}, {transform_indices = @transform_5, window_bounds = array<i64: 1, 4, 64>}]} {
    %c0 = arith.constant 0 : index
    %c0_0 = arith.constant 0 : index
    %c0_1 = arith.constant 0 : index
    %0 = vector.load %arg2[%c0, %c0_0, %c0_1] : memref<1x8x256xf32, #tpu.memory_space<vmem>>, vector<1x8x256xf32>
    %1 = vector.shape_cast %0 : vector<1x8x256xf32> to vector<8x256xf32>
    %c0_2 = arith.constant 0 : index
    %c0_3 = arith.constant 0 : index
    %2 = vector.load %arg3[%c0_2, %c0_3] : memref<8x1xf32, #tpu.memory_space<vmem>>, vector<8x1xf32>
    %3 = vector.broadcast %2 : vector<8x1xf32> to vector<8x256xf32>
    %4 = arith.mulf %1, %3 : vector<8x256xf32>
    %c0_4 = arith.constant 0 : index
    %c0_5 = arith.constant 0 : index
    %5 = vector.load %arg4[%c0_4, %c0_5] : memref<8x1xf32, #tpu.memory_space<vmem>>, vector<8x1xf32>
    %6 = vector.broadcast %5 : vector<8x1xf32> to vector<8x256xf32>
    %7 = arith.addf %4, %6 : vector<8x256xf32>
    %cst = arith.constant 0.000000e+00 : f32
    %8 = vector.broadcast %cst : f32 to vector<8x256xf32>
    %9 = arith.maximumf %7, %8 : vector<8x256xf32>
    %c0_6 = arith.constant 0 : index
    %c0_7 = arith.constant 0 : index
    %10 = vector.load %arg6[%c0_6, %c0_7] : memref<16x8xbf16, #tpu.memory_space<vmem>>, vector<16x8xbf16>
    %11 = vector.extract_strided_slice %9 {offsets = [0, 0], sizes = [8, 16], strides = [1, 1]} : vector<8x256xf32> to vector<8x16xf32>
    %12 = vector.extract_strided_slice %9 {offsets = [0, 16], sizes = [8, 16], strides = [1, 1]} : vector<8x256xf32> to vector<8x16xf32>
    %13 = arith.addf %11, %12 : vector<8x16xf32>
    %14 = arith.truncf %13 : vector<8x16xf32> to vector<8x16xbf16>
    %cst_8 = arith.constant dense<0.000000e+00> : vector<8x8xf32>
    %15 = tpu.matmul %14, %10, %cst_8 {dimension_numbers = #tpu.dot_dimension_numbers<[1], [0], [0], [1], [0, 0, 1, 1], [], []>} : vector<8x16xbf16>, vector<16x8xbf16>, vector<8x8xf32> -> vector<8x8xf32>
    %c0_9 = arith.constant 0 : index
    %c0_10 = arith.constant 0 : index
    %16 = vector.load %arg8[%c0_9, %c0_10] : memref<8x64xf32, #tpu.memory_space<vmem>>, vector<8x8xf32>
    tpu.vector_store %arg8[%c0_9, %c0_10], %15 {strides = array<i32>} : memref<8x64xf32, #tpu.memory_space<vmem>>, vector<8x8xf32>,
    %17 = vector.extract_strided_slice %9 {offsets = [0, 32], sizes = [8, 16], strides = [1, 1]} : vector<8x256xf32> to vector<8x16xf32>
    %18 = vector.extract_strided_slice %9 {offsets = [0, 48], sizes = [8, 16], strides = [1, 1]} : vector<8x256xf32> to vector<8x16xf32>
    %19 = arith.addf %17, %18 : vector<8x16xf32>
    %20 = arith.truncf %19 : vector<8x16xf32> to vector<8x16xbf16>
    %cst_11 = arith.constant dense<0.000000e+00> : vector<8x8xf32>
    %21 = tpu.matmul %20, %10, %cst_11 {dimension_numbers = #tpu.dot_dimension_numbers<[1], [0], [0], [1], [0, 0, 1, 1], [], []>} : vector<8x16xbf16>, vector<16x8xbf16>, vector<8x8xf32> -> vector<8x8xf32>
    %c0_12 = arith.constant 0 : index
    %c8 = arith.constant 8 : index
    %22 = vector.load %arg8[%c0_12, %c8] : memref<8x64xf32, #tpu.memory_space<vmem>>, vector<8x8xf32>
    tpu.vector_store %arg8[%c0_12, %c8], %21 {strides = array<i32>} : memref<8x64xf32, #tpu.memory_space<vmem>>, vector<8x8xf32>,
    %23 = vector.extract_strided_slice %9 {offsets = [0, 64], sizes = [8, 16], strides = [1, 1]} : vector<8x256xf32> to vector<8x16xf32>
    %24 = vector.extract_strided_slice %9 {offsets = [0, 80], sizes = [8, 16], strides = [1, 1]} : vector<8x256xf32> to vector<8x16xf32>
    %25 = arith.addf %23, %24 : vector<8x16xf32>
    %26 = arith.truncf %25 : vector<8x16xf32> to vector<8x16xbf16>
    %cst_13 = arith.constant dense<0.000000e+00> : vector<8x8xf32>
    %27 = tpu.matmul %26, %10, %cst_13 {dimension_numbers = #tpu.dot_dimension_numbers<[1], [0], [0], [1], [0, 0, 1, 1], [], []>} : vector<8x16xbf16>, vector<16x8xbf16>, vector<8x8xf32> -> vector<8x8xf32>
    %c0_14 = arith.constant 0 : index
    %c16 = arith.constant 16 : index
    %28 = vector.load %arg8[%c0_14, %c16] : memref<8x64xf32, #tpu.memory_space<vmem>>, vector<8x8xf32>
    tpu.vector_store %arg8[%c0_14, %c16], %27 {strides = array<i32>} : memref<8x64xf32, #tpu.memory_space<vmem>>, vector<8x8xf32>,
    %29 = vector.extract_strided_slice %9 {offsets = [0, 96], sizes = [8, 16], strides = [1, 1]} : vector<8x256xf32> to vector<8x16xf32>
    %30 = vector.extract_strided_slice %9 {offsets = [0, 112], sizes = [8, 16], strides = [1, 1]} : vector<8x256xf32> to vector<8x16xf32>
    %31 = arith.addf %29, %30 : vector<8x16xf32>
    %32 = arith.truncf %31 : vector<8x16xf32> to vector<8x16xbf16>
    %cst_15 = arith.constant dense<0.000000e+00> : vector<8x8xf32>
    %33 = tpu.matmul %32, %10, %cst_15 {dimension_numbers = #tpu.dot_dimension_numbers<[1], [0], [0], [1], [0, 0, 1, 1], [], []>} : vector<8x16xbf16>, vector<16x8xbf16>, vector<8x8xf32> -> vector<8x8xf32>
    %c0_16 = arith.constant 0 : index
    %c24 = arith.constant 24 : index
    %34 = vector.load %arg8[%c0_16, %c24] : memref<8x64xf32, #tpu.memory_space<vmem>>, vector<8x8xf32>
    tpu.vector_store %arg8[%c0_16, %c24], %33 {strides = array<i32>} : memref<8x64xf32, #tpu.memory_space<vmem>>, vector<8x8xf32>,
    %35 = vector.extract_strided_slice %9 {offsets = [0, 128], sizes = [8, 16], strides = [1, 1]} : vector<8x256xf32> to vector<8x16xf32>
    %36 = vector.extract_strided_slice %9 {offsets = [0, 144], sizes = [8, 16], strides = [1, 1]} : vector<8x256xf32> to vector<8x16xf32>
    %37 = arith.addf %35, %36 : vector<8x16xf32>
    %38 = arith.truncf %37 : vector<8x16xf32> to vector<8x16xbf16>
    %cst_17 = arith.constant dense<0.000000e+00> : vector<8x8xf32>
    %39 = tpu.matmul %38, %10, %cst_17 {dimension_numbers = #tpu.dot_dimension_numbers<[1], [0], [0], [1], [0, 0, 1, 1], [], []>} : vector<8x16xbf16>, vector<16x8xbf16>, vector<8x8xf32> -> vector<8x8xf32>
    %c0_18 = arith.constant 0 : index
    %c32 = arith.constant 32 : index
    %40 = vector.load %arg8[%c0_18, %c32] : memref<8x64xf32, #tpu.memory_space<vmem>>, vector<8x8xf32>
    tpu.vector_store %arg8[%c0_18, %c32], %39 {strides = array<i32>} : memref<8x64xf32, #tpu.memory_space<vmem>>, vector<8x8xf32>,
    %41 = vector.extract_strided_slice %9 {offsets = [0, 160], sizes = [8, 16], strides = [1, 1]} : vector<8x256xf32> to vector<8x16xf32>
    %42 = vector.extract_strided_slice %9 {offsets = [0, 176], sizes = [8, 16], strides = [1, 1]} : vector<8x256xf32> to vector<8x16xf32>
    %43 = arith.addf %41, %42 : vector<8x16xf32>
    %44 = arith.truncf %43 : vector<8x16xf32> to vector<8x16xbf16>
    %cst_19 = arith.constant dense<0.000000e+00> : vector<8x8xf32>
    %45 = tpu.matmul %44, %10, %cst_19 {dimension_numbers = #tpu.dot_dimension_numbers<[1], [0], [0], [1], [0, 0, 1, 1], [], []>} : vector<8x16xbf16>, vector<16x8xbf16>, vector<8x8xf32> -> vector<8x8xf32>
    %c0_20 = arith.constant 0 : index
    %c40 = arith.constant 40 : index
    %46 = vector.load %arg8[%c0_20, %c40] : memref<8x64xf32, #tpu.memory_space<vmem>>, vector<8x8xf32>
    tpu.vector_store %arg8[%c0_20, %c40], %45 {strides = array<i32>} : memref<8x64xf32, #tpu.memory_space<vmem>>, vector<8x8xf32>,
    %47 = vector.extract_strided_slice %9 {offsets = [0, 192], sizes = [8, 16], strides = [1, 1]} : vector<8x256xf32> to vector<8x16xf32>
    %48 = vector.extract_strided_slice %9 {offsets = [0, 208], sizes = [8, 16], strides = [1, 1]} : vector<8x256xf32> to vector<8x16xf32>
    %49 = arith.addf %47, %48 : vector<8x16xf32>
    %50 = arith.truncf %49 : vector<8x16xf32> to vector<8x16xbf16>
    %cst_21 = arith.constant dense<0.000000e+00> : vector<8x8xf32>
    %51 = tpu.matmul %50, %10, %cst_21 {dimension_numbers = #tpu.dot_dimension_numbers<[1], [0], [0], [1], [0, 0, 1, 1], [], []>} : vector<8x16xbf16>, vector<16x8xbf16>, vector<8x8xf32> -> vector<8x8xf32>
    %c0_22 = arith.constant 0 : index
    %c48 = arith.constant 48 : index
    %52 = vector.load %arg8[%c0_22, %c48] : memref<8x64xf32, #tpu.memory_space<vmem>>, vector<8x8xf32>
    tpu.vector_store %arg8[%c0_22, %c48], %51 {strides = array<i32>} : memref<8x64xf32, #tpu.memory_space<vmem>>, vector<8x8xf32>,
    %53 = vector.extract_strided_slice %9 {offsets = [0, 224], sizes = [8, 16], strides = [1, 1]} : vector<8x256xf32> to vector<8x16xf32>
    %54 = vector.extract_strided_slice %9 {offsets = [0, 240], sizes = [8, 16], strides = [1, 1]} : vector<8x256xf32> to vector<8x16xf32>
    %55 = arith.addf %53, %54 : vector<8x16xf32>
    %56 = arith.truncf %55 : vector<8x16xf32> to vector<8x16xbf16>
    %cst_23 = arith.constant dense<0.000000e+00> : vector<8x8xf32>
    %57 = tpu.matmul %56, %10, %cst_23 {dimension_numbers = #tpu.dot_dimension_numbers<[1], [0], [0], [1], [0, 0, 1, 1], [], []>} : vector<8x16xbf16>, vector<16x8xbf16>, vector<8x8xf32> -> vector<8x8xf32>
    %c0_24 = arith.constant 0 : index
    %c56 = arith.constant 56 : index
    %58 = vector.load %arg8[%c0_24, %c56] : memref<8x64xf32, #tpu.memory_space<vmem>>, vector<8x8xf32>
    tpu.vector_store %arg8[%c0_24, %c56], %57 {strides = array<i32>} : memref<8x64xf32, #tpu.memory_space<vmem>>, vector<8x8xf32>,
    %c0_25 = arith.constant 0 : index
    %c0_26 = arith.constant 0 : index
    %59 = vector.load %arg5[%c0_25, %c0_26] : memref<4x8xbf16, #tpu.memory_space<vmem>>, vector<4x8xbf16>
    %c0_27 = arith.constant 0 : index
    %c0_28 = arith.constant 0 : index
    %60 = vector.load %arg8[%c0_27, %c0_28] : memref<8x64xf32, #tpu.memory_space<vmem>>, vector<8x64xf32>
    %61 = arith.truncf %60 : vector<8x64xf32> to vector<8x64xbf16>
    %cst_29 = arith.constant dense<0.000000e+00> : vector<4x64xf32>
    %62 = tpu.matmul %59, %61, %cst_29 {dimension_numbers = #tpu.dot_dimension_numbers<[1], [0], [0], [1], [0, 0, 1, 1], [], []>} : vector<4x8xbf16>, vector<8x64xbf16>, vector<4x64xf32> -> vector<4x64xf32>
    %63 = vector.shape_cast %62 : vector<4x64xf32> to vector<1x4x64xf32>
    %c0_30 = arith.constant 0 : index
    %c0_31 = arith.constant 0 : index
    %c0_32 = arith.constant 0 : index
    %64 = vector.load %arg7[%c0_30, %c0_31, %c0_32] : memref<1x4x64xf32, #tpu.memory_space<vmem>>, vector<1x4x64xf32>
    tpu.vector_store %arg7[%c0_30, %c0_31, %c0_32], %63 {strides = array<i32>} : memref<1x4x64xf32, #tpu.memory_space<vmem>>, vector<1x4x64xf32>,
    return
  }
  func.func @transform_0(%arg0: i32, %arg1: i32) -> (i32, i32, i32) {
    %c0_i32 = arith.constant 0 : i32
    %c0_i32_0 = arith.constant 0 : i32
    return %arg0, %c0_i32, %arg1 : i32, i32, i32
  }
  func.func @transform_1(%arg0: i32, %arg1: i32) -> (i32, i32) {
    %c0_i32 = arith.constant 0 : i32
    %c0_i32_0 = arith.constant 0 : i32
    %c0_i32_1 = arith.constant 0 : i32
    return %c0_i32, %c0_i32_0 : i32, i32
  }
  func.func @transform_2(%arg0: i32, %arg1: i32) -> (i32, i32) {
    %c0_i32 = arith.constant 0 : i32
    %c0_i32_0 = arith.constant 0 : i32
    %c0_i32_1 = arith.constant 0 : i32
    return %c0_i32, %c0_i32_0 : i32, i32
  }
  func.func @transform_3(%arg0: i32, %arg1: i32) -> (i32, i32) {
    %c0_i32 = arith.constant 0 : i32
    %c0_i32_0 = arith.constant 0 : i32
    %c0_i32_1 = arith.constant 0 : i32
    return %c0_i32, %c0_i32_0 : i32, i32
  }
  func.func @transform_4(%arg0: i32, %arg1: i32) -> (i32, i32) {
    %c0_i32 = arith.constant 0 : i32
    %c0_i32_0 = arith.constant 0 : i32
    %c0_i32_1 = arith.constant 0 : i32
    return %c0_i32, %c0_i32_0 : i32, i32
  }
  func.func @transform_5(%arg0: i32, %arg1: i32) -> (i32, i32, i32) {
    %c0_i32 = arith.constant 0 : i32
    %c0_i32_0 = arith.constant 0 : i32
    return %arg0, %c0_i32, %arg1 : i32, i32, i32
  }
}

</mosaic_0001>

<bundles_post_ra>
// kernel: transition_dws_forward.1
= control target key start
LH: loop header
LB: loop body
LE: loop exit
PB: predicated region body
PF: predicated region fallthrough
CT: control target
= control target key end

     0   :  { %s715_s18 = smov 0   ;;  %s717_s19 = smov 0   ;;  %s774_s0 = inlined_call_operand.vmem [shape: f32[2,8,256], index: 0, kind: input, shape index: {}]   ;;  %s775_s1 = inlined_call_operand.vmem [shape: f32[8,1], index: 1, kind: input, shape index: {}]   ;;  %s776_s2 = inlined_call_operand.vmem [shape: f32[8,1], index: 2, kind: input, shape index: {}]   ;;  %s777_s3 = inlined_call_operand.vmem [shape: bf16[4,8], index: 3, kind: input, shape index: {}]   ;;  %s778_s4 = inlined_call_operand.vmem [shape: bf16[16,8], index: 4, kind: input, shape index: {}]   ;;  %s779_s5 = inlined_call_operand.vmem [shape: f32[2,4,64], index: 5, kind: output, shape index: {}]  }
   0x1   :  { %s719_s20 = smov 0  }
   0x2 LB: > { %s27_s21 = sadd.s32 1, %s668_s19  ;;  %p593_p0 = scmp.ge.s32.totalorder %s672_s20, 1  ;;  %s672_s20 = sphi %s719_s20, %s15_s20   ;;  %s668_s19 = sphi %s717_s19, %s781_s19   ;;  %s664_s18 = sphi %s715_s18, %s780_s18  }
   0x3   : > { %p29_p1 = scmp.ge.s32.totalorder %s27_s21, 2  ;;  %p208_p2 = scmp.lt.s32.totalorder %s672_s20, 3 }
   0x5   : > { %s783_s21 = smov (%p29_p1, %s27_s21), 0  ;;  %p209_p3 = pnand %p593_p0, %p208_p2 }
   0x6   : > { %p243_p4 = scmp.lt.s32.totalorder (!%p209_p3), %s664_s18, 1  ;;  %s675_s30 = smov (!%p209_p3), 112  }
   0x7   : > { %212 = sbr.rel (%p209_p3) target bundleno = 780 (0x30c), region = 40  ;;  %s676_s8 = smov (!%p209_p3), 96  }
   0x8   : > { %s677_s9 = smov (!%p209_p3), 64   ;;  %s678_s10 = smov (!%p209_p3), 32  }
   0x9   : > { %s679_s11 = smov (!%p209_p3), 16   ;;  %s680_s12 = smov (!%p209_p3), 24  }
   0xa   : > { %s681_s13 = smov (!%p209_p3), 8   ;;  %s682_s14 = smov (!%p209_p3), 56  }
   0xb   : > { %s683_s15 = smov (!%p209_p3), 48   ;;  %s684_s16 = smov (!%p209_p3), 40  }
   0xc   : > { %v262_v0 = vld [vmem:[%s775_s1] sm:$0xff]  ;;  %v674_v1 = vmov 0   ;;  %s785_s18 = smov (!%p243_p4, %s664_s18), 1  ;;  %vm294_vm0 = vcmask 130048   ;;  %vm311_vm1 = vcmask 64512   ;;  %vm336_vm2 = vcmask 130112  }
   0xd   : > { %649 = vset.pattern.permute.xlu0 %v674_v1  ;;  %v270_v2 = vld [vmem:[%s776_s2] sm:$0xff]  ;;  %s612_s26 = sshll.u32 %s785_s18, 4  ;;  %vm360_vm3 = vcmask 195712   ;;  %vm384_vm4 = vcmask 261312   ;;  %vm412_vm5 = vcmask 326912   ;;  %vm437_vm6 = vcmask 392512  }
   0xe   : > { %265 = vperm.xlu0 %649, %v262_v0   ;;  %s250_s29 = scalar_lea.vmem %s774_s0, %s612_s26  ;;  %v613_v13 = vld [vmem:[%s778_s4] sm:$0xff]  ;;  %vm461_vm7 = vcmask 458112   ;;  %vm485_vm8 = vcmask 523712   ;;  %vm493_vm9 = vcmask 1043456   ;;  %s596_s23 = sshll.u32 %s785_s18, 2  ;;  %vm510_vm10 = vcmask 519168  }
   0xf   : > { %v260_v4 = vld [vmem:[%s250_s29] sm:$0xff]  ;;  %v261_v8 = vld [vmem:[%s250_s29 + $0x8] sm:$0xff]  ;;  %305 = vmatpush.bf16.msra.mxu0 %v613_v13  ;;  %350 = vmatpush.bf16.msra.mxu2 %v613_v13  ;;  %s258_s26 = scalar_lea.vmem %s779_s5, %s596_s23 }
  0x10   : > { %374 = vmatpush.bf16.msra.mxu3 %v613_v13  ;;  %326 = vmatpush.bf16.msra.mxu1 %v613_v13  ;;  %v487_v52 = vld [vmem:[%s777_s3] sm:$0x3] }
  0x13   : > { %402 = vmatpush.bf16.msrb.mxu0 %v613_v13  ;;  %451 = vmatpush.bf16.msrb.mxu2 %v613_v13 }
  0x14   : > { %475 = vmatpush.bf16.msrb.mxu3 %v613_v13  ;;  %427 = vmatpush.bf16.msrb.mxu1 %v613_v13 }
  0x16   : > { %273 = vperm.xlu0 %649, %v270_v2  }
  0x80   : > { %v266_v3 = vpop.permute.xlu0 %265 }
  0x81   : > { %v268_v5 = vmul.f32 %v266_v3, %v260_v4  ;;  %v269_v10 = vmul.f32 %v266_v3, %v261_v8 }
  0x88   : > { %v274_v6 = vpop.permute.xlu0 %273 }
  0x89   : > { %v276_v7 = vadd.f32 %v274_v6, %v268_v5  ;;  %v277_v11 = vadd.f32 %v274_v6, %v269_v10 }
  0x8b   : > { %v278_v9 = vmax.f32 %v276_v7, 0.0  ;;  %v279_v12 = vmax.f32 %v277_v11, 0.0 }
  0x8d   : > { %283 = vrot.lane.b32.xlu1 %v278_v9, %s675_s30 }
  0x95   : > { %387 = vrot.lane.b32.xlu1 %v279_v12, %s675_s30 }
  0xff   : > { %v284_v14 = vpop.permute.xlu1 %283 }
 0x100   : > { %v286_v15 = vadd.f32 %v284_v14, %v278_v9 }
 0x102   : > { %v287_v16 = vpack.c.bf16 %v286_v15, %v286_v15 }
 0x104   : > { %314 = vrot.lane.b32.xlu0 %v287_v16, %s676_s8  ;;  %338 = vrot.lane.b32.xlu2 %v287_v16, %s677_s9 }
 0x105   : > { %601 = vmatmul.msk.bf16.vlgmr.msra.gmra.mxu0 %vm294_vm0, %v287_v16 }
 0x107   : > { %v388_v17 = vpop.permute.xlu1 %387 }
 0x108   : > { %v390_v18 = vadd.f32 %v388_v17, %v279_v12 }
 0x10a   : > { %v391_v19 = vpack.c.bf16 %v390_v18, %v390_v18 }
 0x10c   : > { %362 = vrot.lane.b32.xlu2 %v287_v16, %s678_s10  ;;  %415 = vrot.lane.b32.xlu0 %v391_v19, %s676_s8 }
 0x10d   : > { %439 = vrot.lane.b32.xlu1 %v391_v19, %s677_s9 }
 0x114   : > { %463 = vrot.lane.b32.xlu2 %v391_v19, %s678_s10 }
 0x115   : > { %605 = vmatmul.msk.bf16.vlgmr.msrb.gmra.mxu0 %vm294_vm0, %v391_v19 }
 0x15e   : > { %v339_v20 = vpop.permute.xlu2 %338 }
 0x15f   : > { %603 = vmatmul.msk.bf16.vlgmr.msra.gmra.mxu2 %vm294_vm0, %v339_v20 }
 0x166   : > { %v363_v21 = vpop.permute.xlu2 %362 }
 0x167   : > { %604 = vmatmul.msk.bf16.vlgmr.msra.gmra.mxu3 %vm294_vm0, %v363_v21 }
 0x16e   : > { %v464_v22 = vpop.permute.xlu2 %463 }
 0x176   : > { %v315_v23 = vpop.permute.xlu0 %314 }
 0x177   : > { %602 = vmatmul.msk.bf16.vlgmr.msra.gmra.mxu1 %vm294_vm0, %v315_v23  ;;  %608 = vmatmul.msk.bf16.vlgmr.msrb.gmra.mxu3 %vm294_vm0, %v464_v22 }
 0x17e   : > { %v416_v26 = vpop.permute.xlu0 %415 }
 0x17f   : > { %v440_v24 = vpop.permute.xlu1 %439 }
 0x180   : > { %607 = vmatmul.msk.bf16.vlgmr.msrb.gmra.mxu2 %vm294_vm0, %v440_v24 }
 0x182   : > { %v307_v25 = vpop.f32.mrf.mxu0 }
 0x183   : > { %312 = vst.msk [vmem:[#allocation2] sm:$0xff] %vm311_vm1, %v307_v25 }
 0x187   : > { %606 = vmatmul.msk.bf16.vlgmr.msrb.gmra.mxu1 %vm294_vm0, %v416_v26 }
 0x18a   : > { %v309_v27 = vpop.f32.mrf.mxu0 }
 0x192   : > { %v404_v28 = vpop.f32.mrf.mxu0 }
 0x193   : > { %409 = vrot.lane.b32.xlu1 %v404_v28, %s678_s10 }
 0x19a   : > { %v406_v29 = vpop.f32.mrf.mxu0 }
 0x1e2   : > { %v352_v30 = vpop.f32.mrf.mxu2 }
 0x1e3   : > { %357 = vrot.lane.b32.xlu2 %v352_v30, %s679_s11 }
 0x1ea   : > { %v354_v31 = vpop.f32.mrf.mxu2  ;;  %v376_v32 = vpop.f32.mrf.mxu3 }
 0x1eb   : > { %381 = vrot.lane.b32.xlu0 %v376_v32, %s680_s12 }
 0x1f2   : > { %v378_v33 = vpop.f32.mrf.mxu3 }
 0x1f4   : > { %v328_v34 = vpop.f32.mrf.mxu1 }
 0x1f5   : > { %333 = vrot.lane.b32.xlu1 %v328_v34, %s681_s13 }
 0x1fa   : > { %v477_v35 = vpop.f32.mrf.mxu3 }
 0x1fc   : > { %v330_v36 = vpop.f32.mrf.mxu1 }
 0x1fd   : > { %482 = vrot.lane.b32.xlu1 %v477_v35, %s682_s14 }
 0x202   : > { %v479_v37 = vpop.f32.mrf.mxu3 }
 0x203   : > { %v453_v38 = vpop.f32.mrf.mxu2 }
 0x204   : > { %458 = vrot.lane.b32.xlu0 %v453_v38, %s683_s15  ;;  %v429_v39 = vpop.f32.mrf.mxu1 }
 0x205   : > { %434 = vrot.lane.b32.xlu2 %v429_v39, %s684_s16  ;;  %v410_v42 = vpop.permute.xlu1 %409 }
 0x20b   : > { %v455_v40 = vpop.f32.mrf.mxu2 }
 0x20c   : > { %v431_v41 = vpop.f32.mrf.mxu1 }
 0x23d   : > { %v358_v43 = vpop.permute.xlu2 %357 }
 0x25d   : > { %v382_v45 = vpop.permute.xlu0 %381 }
 0x25f   : > { %v435_v46 = vpop.permute.xlu2 %434 }
 0x267   : > { %v334_v44 = vpop.permute.xlu1 %333 }
 0x268   : > { %337 = vst.msk [vmem:[#allocation2] sm:$0xff] %vm336_vm2, %v334_v44 }
 0x269   : > { %361 = vst.msk [vmem:[#allocation2] sm:$0xff] %vm360_vm3, %v358_v43 }
 0x26a   : > { %385 = vst.msk [vmem:[#allocation2] sm:$0xff] %vm384_vm4, %v382_v45 }
 0x26b   : > { %413 = vst.msk [vmem:[#allocation2] sm:$0xff] %vm412_vm5, %v410_v42 }
 0x26c   : > { %438 = vst.msk [vmem:[#allocation2] sm:$0xff] %vm437_vm6, %v435_v46 }
 0x26f   : > { %v483_v48 = vpop.permute.xlu1 %482 }
 0x276   : > { %v459_v47 = vpop.permute.xlu0 %458 }
 0x277   : > { %462 = vst.msk [vmem:[#allocation2] sm:$0xff] %vm461_vm7, %v459_v47 }
 0x278   : > { %486 = vst.msk [vmem:[#allocation2] sm:$0xff] %vm485_vm8, %v483_v48 }
 0x27f   : > { %v488_v49 = vld [vmem:[#allocation2] sm:$0xff] }
 0x280   : > { %v489_v50 = vpack.c.bf16 %v488_v49, %v488_v49 }
 0x282   : > { %v495_v51 = vsel %vm493_vm9, %v489_v50, 0 }
 0x283   : > { %504 = vmatpush.bf16.msra.mxu0 %v495_v51 }
 0x286   : > { %609 = vmatmul.msk.bf16.vlgmr.msra.gmra.mxu0 %vm311_vm1, %v487_v52 }
 0x303   : > { %v506_v53 = vpop.f32.mrf.mxu0 }
 0x304   : > { %511 = vst.msk [vmem:[%s258_s26] sm:$0xf] %vm510_vm10, %v506_v53 }
 0x30b   : > { %v508_v54 = vpop.f32.mrf.mxu0 }
 0x30c PF: > { %s15_s20 = sadd.s32 1, %s672_s20   ;;  %s780_s18 = smov %s668_s19 }
 0x30d   : > { %p12_p5 = scmp.ge.s32.totalorder %s15_s20, 4   ;;  %s781_s19 = smov %s783_s21 }
 0x30f   :  { %14 = sbr.rel (!%p12_p5) target bundleno = 2 (0x2), region = 70 }

</bundles_post_ra>
